<compile_context>
chip_gen: v7x
topology: tpu7x:2x2x1
jax: 0.10.0
libtpu: 0.0.40
codegen_flags: <defaults>
</compile_context>

<pallas_src>
import jax
import jax.numpy as jnp
from jax.experimental import pallas as pl
from jax.experimental.pallas import tpu as pltpu


def _relu_kernel(x_ref, o_ref):
    # Pure elementwise load -> max -> store; Mosaic streams this per vreg tile.
    x = x_ref[...]
    o_ref[...] = jnp.maximum(x, jnp.zeros((), x.dtype))


def _sublane_pack(dtype) -> int:
    """Second-to-last-dim packing multiple for the dtype (32-bit vregs)."""
    return {4: 8, 2: 16, 1: 32}.get(jnp.dtype(dtype).itemsize, 8)


def _num_tensorcores() -> int:
    """Per-chip TensorCore count (v7x has 2); safe fallback if unavailable."""
    try:
        info = pltpu.get_tpu_info()
    except Exception:
        return 2
    for attr in ("num_cores", "tensorcores_per_chip", "cores_per_chip",
                 "core_count"):
        n = getattr(info, attr, None)
        if isinstance(n, int) and n >= 1:
            return min(n, 8)
    return 2


def _choose_lane_dense_layout(total, dtype, target_block_bytes, min_steps):
    """Pick (rows, cols, tile_r, steps) with cols % 128 == 0 and tile_r % sub == 0.

    Returns None only when total is not a multiple of (sublane_pack * 128); in
    that case the caller uses a full-extent-last-dim layout (legal, lane-sparse).
    """
    lane = 128
    sub = _sublane_pack(dtype)
    itemsize = jnp.dtype(dtype).itemsize
    if total % (sub * lane) != 0:
        return None
    total_bytes = total * itemsize

    # Grid steps ~= total_bytes / target, rounded up to a multiple of the core
    # count so dual-TC chips (v7x) split the work evenly via "parallel".
    min_steps = max(1, min_steps)
    want = max(min_steps, -(-total_bytes // target_block_bytes))
    want = -(-want // min_steps) * min_steps

    # Preferred layout: one (sub, cols) block per step, cols a multiple of 128.
    for steps in range(want, want + 4096 + 1, min_steps):
        rows = steps * sub
        if total % rows == 0 and (total // rows) % lane == 0:
            return rows, total // rows, sub, steps

    # Robust lane-dense fallback: tall-skinny (rows, 128) slab, row tiles sized
    # near the target.  Always valid given the divisibility check above.
    cols = lane
    rows = total // cols
    tile_r = sub
    while (tile_r * 2 <= rows and rows % (tile_r * 2) == 0
           and tile_r * 2 * cols * itemsize <= target_block_bytes):
        tile_r *= 2
    return rows, cols, tile_r, rows // tile_r


def relu_pallas(x):
    """ReLU on an NCHW tensor; hot path is a single lane-dense Pallas kernel."""
    orig_shape = x.shape
    total = x.size
    dtype = x.dtype
    itemsize = jnp.dtype(dtype).itemsize
    total_bytes = total * itemsize
    sub = _sublane_pack(dtype)

    target_block_bytes = 2 << 20  # 2 MiB blocks: in+out double-buffered = 8 MiB
    min_steps = _num_tensorcores()

    layout = _choose_lane_dense_layout(total, dtype, target_block_bytes,
                                       min_steps)
    if layout is not None:
        rows, cols, tile_r, _ = layout
    else:
        # Lane-sparse but legal fallback: full-extent last dim, tile the rows.
        cols = orig_shape[-1] if len(orig_shape) else 1
        rows = total // cols
        tile_r = rows
        if rows % sub == 0:
            tile_r = sub
            while (tile_r * 2 <= rows
                   and rows % (tile_r * 2) == 0
                   and tile_r * 2 * cols * itemsize <= target_block_bytes):
                tile_r *= 2

    x2d = x.reshape(rows, cols)

    out2d = pl.pallas_call(
        _relu_kernel,
        out_shape=jax.ShapeDtypeStruct((rows, cols), dtype),
        grid=(rows // tile_r,),
        in_specs=[pl.BlockSpec((tile_r, cols), lambda i: (i, 0))],
        out_specs=pl.BlockSpec((tile_r, cols), lambda i: (i, 0)),
        input_output_aliases={0: 0},  # ReLU(inplace=True)
        cost_estimate=pl.CostEstimate(
            flops=total, transcendentals=0, bytes_accessed=2 * total_bytes),
        compiler_params=pltpu.CompilerParams(
            dimension_semantics=("parallel",)),
    )(x2d)

    return out2d.reshape(orig_shape)


if __name__ == "__main__":
    key = jax.random.PRNGKey(0)
    # Shape matches the module's forward input: [1, 256, 28, 28] f32
    # (200704 elems -> lane-dense (16, 12544) slab, 2 parallel grid steps).
    x = jax.random.normal(key, (1, 256, 28, 28), dtype=jnp.float32)

    y = relu_pallas(x)
    jax.block_until_ready(y)

    # ReLU is exact, so compare bit-for-bit against the plain JAX reference.
    y_ref = jnp.maximum(x, 0.0)
    assert y.shape == x.shape and y.dtype == x.dtype
    assert jnp.array_equal(y, y_ref)

    print("KERNEL_OK")
</pallas_src>

<mosaic_0001>
module attributes {stable_mosaic.version = 11 : i64} {
  func.func @_relu_kernel(%arg0: i32, %arg1: memref<8x12544xf32, #tpu.memory_space<vmem>>, %arg2: memref<8x12544xf32, #tpu.memory_space<vmem>>) attributes {dimension_semantics = [#tpu.dimension_semantics<parallel>], iteration_bounds = array<i64: 2>, scalar_prefetch = 0 : i64, scratch_operands = 0 : i64, tpu.core_type = #tpu.core_type<tc>, window_params = [{transform_indices = @transform_0, window_bounds = array<i64: 8, 12544>}, {transform_indices = @transform_1, window_bounds = array<i64: 8, 12544>}]} {
    %c0 = arith.constant 0 : index
    %c0_0 = arith.constant 0 : index
    %0 = vector.load %arg1[%c0, %c0_0] : memref<8x12544xf32, #tpu.memory_space<vmem>>, vector<8x12544xf32>
    %cst = arith.constant 0.000000e+00 : f32
    %1 = vector.broadcast %cst : f32 to vector<8x12544xf32>
    %2 = arith.maximumf %0, %1 : vector<8x12544xf32>
    %c0_1 = arith.constant 0 : index
    %c0_2 = arith.constant 0 : index
    %3 = vector.load %arg2[%c0_1, %c0_2] : memref<8x12544xf32, #tpu.memory_space<vmem>>, vector<8x12544xf32>
    tpu.vector_store %arg2[%c0_1, %c0_2], %2 {strides = array<i32>} : memref<8x12544xf32, #tpu.memory_space<vmem>>, vector<8x12544xf32>,
    return
  }
  func.func @transform_0(%arg0: i32) -> (i32, i32) {
    %c0_i32 = arith.constant 0 : i32
    %c0_i32_0 = arith.constant 0 : i32
    return %arg0, %c0_i32 : i32, i32
  }
  func.func @transform_1(%arg0: i32) -> (i32, i32) {
    %c0_i32 = arith.constant 0 : i32
    %c0_i32_0 = arith.constant 0 : i32
    return %arg0, %c0_i32 : i32, i32
  }
}

</mosaic_0001>

<bundles_post_ra>
// kernel: tpu_custom_call.1
= control target key start
LH: loop header
LB: loop body
LE: loop exit
PB: predicated region body
PF: predicated region fallthrough
CT: control target
= control target key end

     0   :  { %6 = vsyncpa [#allocation3], 0  ;;  %s1040_s0 = inlined_call_operand.hbm [shape: f32[16,12544], index: 0, kind: input, shape index: {}, may-alias: {0,1}]   ;;  %s1041_s1 = inlined_call_operand.hbm [shape: f32[16,12544], index: 1, kind: output, shape index: {}, may-alias: {0,1}]  }
   0x1   :  { %8 = vsyncpa [#allocation3 + $0x1], 0 }
   0x2   :  { %9 = vsyncpa [#allocation4], 0 }
   0x3   :  { %11 = vsyncpa [#allocation4 + $0x1], 0  ;;  %s680_s6 = smov 0   ;;  %s682_s7 = smov 0  }
   0x4   :  { %s684_s8 = smov 0   ;;  %s686_s9 = smov 0  }
   0x5 LB: > { %s701_s10 = sadd.s32 4294967295, %s666_s9   ;;  %s512_s11 = sadd.s32 4294967294, %s666_s9   ;;  %s666_s9 = sphi %s686_s9, %s1055_s9   ;;  %s662_s8 = sphi %s684_s8, %s1054_s8   ;;  %s658_s7 = sphi %s682_s7, %s1053_s7   ;;  %s654_s6 = sphi %s680_s6, %s1052_s6  }
   0x6   : > { %s705_s12 = sadd.s32 1, %s666_s9   ;;  %s24_s13 = sadd.s32 1, %s662_s8 }
   0x7   : > { %s21_s14 = ssub.s32 %s666_s9, %s705_s12  ;;  %p31_p0 = scmp.ne.s32.totalorder %s662_s8, %s658_s7 }
   0x8   : > { %p22_p1 = scmp.eq.s32.totalorder %s21_s14, 0  ;;  %p32_p2 = scmp.eq.s32.totalorder %s666_s9, 0 }
   0x9   : > { %p37_p3 = scmp.ne.s32.totalorder %s658_s7, %s654_s6  ;;  %p38_p4 = scmp.eq.s32.totalorder %s701_s10, 0 }
   0xa   : > { %s717_s15 = scalar_select %p22_p1, %s662_s8, %s24_s13  }
   0xb   : > { %p33_p5 = por %p32_p2, %p31_p0  ;;  %p719_p6 = por %p38_p4, %p37_p3 }
   0xc   : > { %p61_p7 = scmp.eq.s32.totalorder %s701_s10, 1  ;;  %p67_p8 = scmp.eq.s32.totalorder %s512_s11, 1 }
   0xd   : > { %p536_p10 = scmp.lt.s32.totalorder %s666_s9, 2  ;;  %s87_s19 = sand.u32 1, %s662_s8  }
   0xe   : > { %p726_p11 = por %p61_p7, %p31_p0  ;;  %p730_p12 = por %p67_p8, %p37_p3 }
   0xf   : > { %s521_s20 = smul.u32 12544, %s666_s9  ;;  %p741_p13 = pnand %p536_p10, %p33_p5 }
  0x10   : > { %s1044_s17 = scalar_select %p726_p11, 1, 0 }
  0x11   : > { %s1045_s18 = scalar_select %p730_p12, 1, 0 }
  0x12   : > { %s520_s21 = smul.u32 784, %s87_s19  ;;  %s739_s24 = scalar_lea.hbm %s1040_s0, %s521_s20 }
  0x13   : > { %s88_s28 = scalar_lea.sflag [#allocation3], %s87_s19  ;;  %s570_s29 = scalar_lea.hbm %s739_s24, 12544 }
  0x14   : > { %s91_s26 = scalar_lea.vmem [#allocation2], %s520_s21  ;;  %p571_p2 = scmp.ne.s32.totalorder %s739_s24, %s570_s29 }
  0x15   : > { %s99_s27 = sshll.u32 %s91_s26, 4  ;;  %p572_p3 = pneg %p741_p13  ;;  %s746_s27 = int_to_ptr.vmem [resolvable:$true] %s99_s27 }
  0x16   : > { %s575_s3 = scalar_lea.hbm %s1040_s0, 25088  ;;  %p576_p7 = scmp.lt.u32.totalorder %s739_s24, %s1040_s0 }
  0x17   : > { %p573_p4 = pnand %p572_p3, %p571_p2  ;;  %p577_p8 = scmp.lt.u32.totalorder %s575_s3, %s570_s29 }
  0x18   : > { %p579_p9 = scmp.lt.u32.totalorder %s570_s29, %s739_s24 }
  0x19   : > { %p574_p5 = pneg %p573_p4  ;;  %p578_p10 = por %p577_p8, %p576_p7 }
  0x1b   : > { %p580_p0 = por %p579_p9, %p578_p10 }
  0x1d   : > { %p581_p1 = pnand %p580_p0, %p574_p5 }
  0x1f   : > { %584 = shalt.err (!%p581_p1)
}
  0x20   : > { %s585_s11 = scalar_lea.vmem %s746_s27, 12544  ;;  %s668_s13 = smov [#allocation2]  }
  0x21   : > { %p586_p2 = scmp.ne.s32.totalorder %s746_s27, %s585_s11  ;;  %s590_s14 = sshll.u32 %s668_s13, 4  ;;  %s591_s14 = int_to_ptr.vmem [resolvable:$false] %s590_s14 }
  0x22   : > { %s592_s19 = scalar_lea.vmem %s591_s14, 25088  ;;  %p593_p11 = scmp.lt.s32.totalorder %s746_s27, %s591_s14 }
  0x23   : > { %p588_p4 = pnand %p586_p2, %p572_p3  ;;  %p594_p7 = scmp.lt.s32.totalorder %s592_s19, %s585_s11 }
  0x25   : > { %p589_p12 = pneg %p588_p4  ;;  %p595_p8 = por %p594_p7, %p593_p11 }
  0x27   : > { %p596_p9 = pnand %p595_p8, %p589_p12 }
  0x29   : > { %599 = shalt.err (!%p596_p9)
}
  0x2a   : > { %531 = dma.hbm_to_vmem [thread:$0]  (!%p741_p13), %s739_s24, 12544, %s746_s27, %s88_s28  }
  0x2b   : > { %p1047_p0 = scmp.lt.s32.totalorder %s666_s9, 3  ;;  %p1048_p1 = scmp.ge.s32.totalorder %s666_s9, 1 }
  0x2d   : > { %p105_p3 = pnand %p1048_p1, %p1047_p0 }
  0x2e   : > { %s779_s20 = sand.u32 (!%p105_p3), 1, %s658_s7  }
  0x2f   : > { %108 = sbr.rel (%p105_p3) target bundleno = 127 (0x7f), region = 24  ;;  %s111_s22 = scalar_lea.sflag (!%p105_p3), [#allocation3], %s779_s20 }
  0x30   : > { %s522_s21 = smul.u32 (!%p105_p3), 784, %s779_s20 }
  0x32   : > { %s783_s23 = scalar_lea.vmem (!%p105_p3), [#allocation2], %s522_s21 }
  0x36   : > { %645 = dma.done.wait (%p719_p6), %s111_s22, 12544  }
  0x37   : > { %647 = vsyncadd (%p719_p6), %s111_s22, 4294954752  ;;  %v133_v0 = vld [vmem:[%s783_s23] sm:$0xff]  ;;  %v134_v1 = vld [vmem:[%s783_s23 + $0x8] sm:$0xff]  ;;  %s523_s24 = smul.u32 12544, %s701_s10  ;;  %s793_s25 = scalar_lea.vmem [#allocation5], %s522_s21 }
  0x38   : > { %v135_v2 = vld [vmem:[%s783_s23 + $0x10] sm:$0xff]  ;;  %s442_s16 = sshll.u32 %s793_s25, 4  ;;  %v231_v3 = vmax.f32 %v133_v0, 0.0  ;;  %v232_v4 = vmax.f32 %v134_v1, 0.0  ;;  %v136_v6 = vld [vmem:[%s783_s23 + $0x18] sm:$0xff]  ;;  %v137_v7 = vld [vmem:[%s783_s23 + $0x20] sm:$0xff]  ;;  %s993_s16 = int_to_ptr.vmem [resolvable:$true] %s442_s16 }
  0x39   : > { %v233_v5 = vmax.f32 %v135_v2, 0.0  ;;  %v138_v8 = vld [vmem:[%s783_s23 + $0x28] sm:$0xff]  ;;  %v234_v9 = vmax.f32 %v136_v6, 0.0  ;;  %v235_v10 = vmax.f32 %v137_v7, 0.0  ;;  %v139_v12 = vld [vmem:[%s783_s23 + $0x30] sm:$0xff]  ;;  %v140_v13 = vld [vmem:[%s783_s23 + $0x38] sm:$0xff]  ;;  %s989_s28 = scalar_lea.hbm %s1041_s1, %s523_s24 }
  0x3a   : > { %v236_v11 = vmax.f32 %v138_v8, 0.0  ;;  %v141_v14 = vld [vmem:[%s783_s23 + $0x40] sm:$0xff]  ;;  %329 = vst [vmem:[%s793_s25] sm:$0xff] %v231_v3  ;;  %330 = vst [vmem:[%s793_s25 + $0x8] sm:$0xff] %v232_v4  ;;  %v237_v15 = vmax.f32 %v139_v12, 0.0  ;;  %v238_v16 = vmax.f32 %v140_v13, 0.0  ;;  %v142_v18 = vld [vmem:[%s783_s23 + $0x48] sm:$0xff] }
  0x3b   : > { %331 = vst [vmem:[%s793_s25 + $0x10] sm:$0xff] %v233_v5  ;;  %v239_v17 = vmax.f32 %v141_v14, 0.0  ;;  %v143_v19 = vld [vmem:[%s783_s23 + $0x50] sm:$0xff]  ;;  %v144_v20 = vld [vmem:[%s783_s23 + $0x58] sm:$0xff]  ;;  %332 = vst [vmem:[%s793_s25 + $0x18] sm:$0xff] %v234_v9  ;;  %v240_v21 = vmax.f32 %v142_v18, 0.0 }
  0x3c   : > { %333 = vst [vmem:[%s793_s25 + $0x20] sm:$0xff] %v235_v10  ;;  %334 = vst [vmem:[%s793_s25 + $0x28] sm:$0xff] %v236_v11  ;;  %v241_v22 = vmax.f32 %v143_v19, 0.0  ;;  %v242_v23 = vmax.f32 %v144_v20, 0.0  ;;  %v145_v24 = vld [vmem:[%s783_s23 + $0x60] sm:$0xff]  ;;  %v146_v25 = vld [vmem:[%s783_s23 + $0x68] sm:$0xff] }
  0x3d   : > { %v147_v26 = vld [vmem:[%s783_s23 + $0x70] sm:$0xff]  ;;  %335 = vst [vmem:[%s793_s25 + $0x30] sm:$0xff] %v237_v15  ;;  %336 = vst [vmem:[%s793_s25 + $0x38] sm:$0xff] %v238_v16  ;;  %v243_v27 = vmax.f32 %v145_v24, 0.0  ;;  %v244_v28 = vmax.f32 %v146_v25, 0.0  ;;  %v148_v30 = vld [vmem:[%s783_s23 + $0x78] sm:$0xff] }
  0x3e   : > { %337 = vst [vmem:[%s793_s25 + $0x40] sm:$0xff] %v239_v17  ;;  %v245_v29 = vmax.f32 %v147_v26, 0.0  ;;  %v149_v31 = vld [vmem:[%s783_s23 + $0x80] sm:$0xff]  ;;  %v150_v32 = vld [vmem:[%s783_s23 + $0x88] sm:$0xff]  ;;  %338 = vst [vmem:[%s793_s25 + $0x48] sm:$0xff] %v240_v21  ;;  %v246_v33 = vmax.f32 %v148_v30, 0.0 }
  0x3f   : > { %339 = vst [vmem:[%s793_s25 + $0x50] sm:$0xff] %v241_v22  ;;  %340 = vst [vmem:[%s793_s25 + $0x58] sm:$0xff] %v242_v23  ;;  %v247_v34 = vmax.f32 %v149_v31, 0.0  ;;  %v248_v35 = vmax.f32 %v150_v32, 0.0  ;;  %v151_v36 = vld [vmem:[%s783_s23 + $0x90] sm:$0xff]  ;;  %v152_v37 = vld [vmem:[%s783_s23 + $0x98] sm:$0xff] }
  0x40   : > { %v153_v38 = vld [vmem:[%s783_s23 + $0xa0] sm:$0xff]  ;;  %341 = vst [vmem:[%s793_s25 + $0x60] sm:$0xff] %v243_v27  ;;  %342 = vst [vmem:[%s793_s25 + $0x68] sm:$0xff] %v244_v28  ;;  %v249_v39 = vmax.f32 %v151_v36, 0.0  ;;  %v250_v40 = vmax.f32 %v152_v37, 0.0  ;;  %v154_v42 = vld [vmem:[%s783_s23 + $0xa8] sm:$0xff] }
  0x41   : > { %343 = vst [vmem:[%s793_s25 + $0x70] sm:$0xff] %v245_v29  ;;  %v251_v41 = vmax.f32 %v153_v38, 0.0  ;;  %v155_v43 = vld [vmem:[%s783_s23 + $0xb0] sm:$0xff]  ;;  %v156_v44 = vld [vmem:[%s783_s23 + $0xb8] sm:$0xff]  ;;  %344 = vst [vmem:[%s793_s25 + $0x78] sm:$0xff] %v246_v33  ;;  %v252_v45 = vmax.f32 %v154_v42, 0.0 }
  0x42   : > { %345 = vst [vmem:[%s793_s25 + $0x80] sm:$0xff] %v247_v34  ;;  %346 = vst [vmem:[%s793_s25 + $0x88] sm:$0xff] %v248_v35  ;;  %v253_v46 = vmax.f32 %v155_v43, 0.0  ;;  %v254_v47 = vmax.f32 %v156_v44, 0.0  ;;  %v157_v48 = vld [vmem:[%s783_s23 + $0xc0] sm:$0xff]  ;;  %v158_v49 = vld [vmem:[%s783_s23 + $0xc8] sm:$0xff] }
  0x43   : > { %v159_v50 = vld [vmem:[%s783_s23 + $0xd0] sm:$0xff]  ;;  %347 = vst [vmem:[%s793_s25 + $0x90] sm:$0xff] %v249_v39  ;;  %348 = vst [vmem:[%s793_s25 + $0x98] sm:$0xff] %v250_v40  ;;  %v255_v51 = vmax.f32 %v157_v48, 0.0  ;;  %v256_v52 = vmax.f32 %v158_v49, 0.0  ;;  %v160_v54 = vld [vmem:[%s783_s23 + $0xd8] sm:$0xff] }
  0x44   : > { %349 = vst [vmem:[%s793_s25 + $0xa0] sm:$0xff] %v251_v41  ;;  %v257_v53 = vmax.f32 %v159_v50, 0.0  ;;  %v161_v55 = vld [vmem:[%s783_s23 + $0xe0] sm:$0xff]  ;;  %v162_v56 = vld [vmem:[%s783_s23 + $0xe8] sm:$0xff]  ;;  %350 = vst [vmem:[%s793_s25 + $0xa8] sm:$0xff] %v252_v45  ;;  %v258_v57 = vmax.f32 %v160_v54, 0.0 }
  0x45   : > { %351 = vst [vmem:[%s793_s25 + $0xb0] sm:$0xff] %v253_v46  ;;  %352 = vst [vmem:[%s793_s25 + $0xb8] sm:$0xff] %v254_v47  ;;  %v259_v58 = vmax.f32 %v161_v55, 0.0  ;;  %v260_v59 = vmax.f32 %v162_v56, 0.0  ;;  %v163_v60 = vld [vmem:[%s783_s23 + $0xf0] sm:$0xff]  ;;  %v164_v61 = vld [vmem:[%s783_s23 + $0xf8] sm:$0xff] }
  0x46   : > { %v165_v62 = vld [vmem:[%s783_s23 + $0x100] sm:$0xff]  ;;  %353 = vst [vmem:[%s793_s25 + $0xc0] sm:$0xff] %v255_v51  ;;  %354 = vst [vmem:[%s793_s25 + $0xc8] sm:$0xff] %v256_v52  ;;  %v261_v63 = vmax.f32 %v163_v60, 0.0  ;;  %v262_v0 = vmax.f32 %v164_v61, 0.0  ;;  %v166_v2 = vld [vmem:[%s783_s23 + $0x108] sm:$0xff] }
  0x47   : > { %355 = vst [vmem:[%s793_s25 + $0xd0] sm:$0xff] %v257_v53  ;;  %v263_v1 = vmax.f32 %v165_v62, 0.0  ;;  %v167_v3 = vld [vmem:[%s783_s23 + $0x110] sm:$0xff]  ;;  %v168_v4 = vld [vmem:[%s783_s23 + $0x118] sm:$0xff]  ;;  %356 = vst [vmem:[%s793_s25 + $0xd8] sm:$0xff] %v258_v57  ;;  %v264_v5 = vmax.f32 %v166_v2, 0.0 }
  0x48   : > { %357 = vst [vmem:[%s793_s25 + $0xe0] sm:$0xff] %v259_v58  ;;  %358 = vst [vmem:[%s793_s25 + $0xe8] sm:$0xff] %v260_v59  ;;  %v265_v6 = vmax.f32 %v167_v3, 0.0  ;;  %v266_v7 = vmax.f32 %v168_v4, 0.0  ;;  %v169_v8 = vld [vmem:[%s783_s23 + $0x120] sm:$0xff]  ;;  %v170_v9 = vld [vmem:[%s783_s23 + $0x128] sm:$0xff] }
  0x49   : > { %v171_v10 = vld [vmem:[%s783_s23 + $0x130] sm:$0xff]  ;;  %359 = vst [vmem:[%s793_s25 + $0xf0] sm:$0xff] %v261_v63  ;;  %360 = vst [vmem:[%s793_s25 + $0xf8] sm:$0xff] %v262_v0  ;;  %v267_v11 = vmax.f32 %v169_v8, 0.0  ;;  %v268_v12 = vmax.f32 %v170_v9, 0.0  ;;  %v172_v14 = vld [vmem:[%s783_s23 + $0x138] sm:$0xff] }
  0x4a   : > { %361 = vst [vmem:[%s793_s25 + $0x100] sm:$0xff] %v263_v1  ;;  %v269_v13 = vmax.f32 %v171_v10, 0.0  ;;  %v173_v15 = vld [vmem:[%s783_s23 + $0x140] sm:$0xff]  ;;  %v174_v16 = vld [vmem:[%s783_s23 + $0x148] sm:$0xff]  ;;  %362 = vst [vmem:[%s793_s25 + $0x108] sm:$0xff] %v264_v5  ;;  %v270_v17 = vmax.f32 %v172_v14, 0.0 }
  0x4b   : > { %363 = vst [vmem:[%s793_s25 + $0x110] sm:$0xff] %v265_v6  ;;  %364 = vst [vmem:[%s793_s25 + $0x118] sm:$0xff] %v266_v7  ;;  %v271_v18 = vmax.f32 %v173_v15, 0.0  ;;  %v272_v19 = vmax.f32 %v174_v16, 0.0  ;;  %v175_v20 = vld [vmem:[%s783_s23 + $0x150] sm:$0xff]  ;;  %v176_v21 = vld [vmem:[%s783_s23 + $0x158] sm:$0xff] }
  0x4c   : > { %v177_v22 = vld [vmem:[%s783_s23 + $0x160] sm:$0xff]  ;;  %365 = vst [vmem:[%s793_s25 + $0x120] sm:$0xff] %v267_v11  ;;  %366 = vst [vmem:[%s793_s25 + $0x128] sm:$0xff] %v268_v12  ;;  %v273_v23 = vmax.f32 %v175_v20, 0.0  ;;  %v274_v24 = vmax.f32 %v176_v21, 0.0  ;;  %v178_v26 = vld [vmem:[%s783_s23 + $0x168] sm:$0xff] }
  0x4d   : > { %367 = vst [vmem:[%s793_s25 + $0x130] sm:$0xff] %v269_v13  ;;  %v275_v25 = vmax.f32 %v177_v22, 0.0  ;;  %v179_v27 = vld [vmem:[%s783_s23 + $0x170] sm:$0xff]  ;;  %v180_v28 = vld [vmem:[%s783_s23 + $0x178] sm:$0xff]  ;;  %368 = vst [vmem:[%s793_s25 + $0x138] sm:$0xff] %v270_v17  ;;  %v276_v29 = vmax.f32 %v178_v26, 0.0 }
  0x4e   : > { %369 = vst [vmem:[%s793_s25 + $0x140] sm:$0xff] %v271_v18  ;;  %370 = vst [vmem:[%s793_s25 + $0x148] sm:$0xff] %v272_v19  ;;  %v277_v30 = vmax.f32 %v179_v27, 0.0  ;;  %v278_v31 = vmax.f32 %v180_v28, 0.0  ;;  %v181_v32 = vld [vmem:[%s783_s23 + $0x180] sm:$0xff]  ;;  %v182_v33 = vld [vmem:[%s783_s23 + $0x188] sm:$0xff] }
  0x4f   : > { %v183_v34 = vld [vmem:[%s783_s23 + $0x190] sm:$0xff]  ;;  %371 = vst [vmem:[%s793_s25 + $0x150] sm:$0xff] %v273_v23  ;;  %372 = vst [vmem:[%s793_s25 + $0x158] sm:$0xff] %v274_v24  ;;  %v279_v35 = vmax.f32 %v181_v32, 0.0  ;;  %v280_v36 = vmax.f32 %v182_v33, 0.0  ;;  %v184_v38 = vld [vmem:[%s783_s23 + $0x198] sm:$0xff] }
  0x50   : > { %373 = vst [vmem:[%s793_s25 + $0x160] sm:$0xff] %v275_v25  ;;  %v281_v37 = vmax.f32 %v183_v34, 0.0  ;;  %v185_v39 = vld [vmem:[%s783_s23 + $0x1a0] sm:$0xff]  ;;  %v186_v40 = vld [vmem:[%s783_s23 + $0x1a8] sm:$0xff]  ;;  %374 = vst [vmem:[%s793_s25 + $0x168] sm:$0xff] %v276_v29  ;;  %v282_v41 = vmax.f32 %v184_v38, 0.0 }
  0x51   : > { %375 = vst [vmem:[%s793_s25 + $0x170] sm:$0xff] %v277_v30  ;;  %376 = vst [vmem:[%s793_s25 + $0x178] sm:$0xff] %v278_v31  ;;  %v283_v42 = vmax.f32 %v185_v39, 0.0  ;;  %v284_v43 = vmax.f32 %v186_v40, 0.0  ;;  %v187_v44 = vld [vmem:[%s783_s23 + $0x1b0] sm:$0xff]  ;;  %v188_v45 = vld [vmem:[%s783_s23 + $0x1b8] sm:$0xff] }
  0x52   : > { %v189_v46 = vld [vmem:[%s783_s23 + $0x1c0] sm:$0xff]  ;;  %377 = vst [vmem:[%s793_s25 + $0x180] sm:$0xff] %v279_v35  ;;  %378 = vst [vmem:[%s793_s25 + $0x188] sm:$0xff] %v280_v36  ;;  %v285_v47 = vmax.f32 %v187_v44, 0.0  ;;  %v286_v48 = vmax.f32 %v188_v45, 0.0  ;;  %v190_v50 = vld [vmem:[%s783_s23 + $0x1c8] sm:$0xff] }
  0x53   : > { %379 = vst [vmem:[%s793_s25 + $0x190] sm:$0xff] %v281_v37  ;;  %v287_v49 = vmax.f32 %v189_v46, 0.0  ;;  %v191_v51 = vld [vmem:[%s783_s23 + $0x1d0] sm:$0xff]  ;;  %v192_v52 = vld [vmem:[%s783_s23 + $0x1d8] sm:$0xff]  ;;  %380 = vst [vmem:[%s793_s25 + $0x198] sm:$0xff] %v282_v41  ;;  %v288_v53 = vmax.f32 %v190_v50, 0.0 }
  0x54   : > { %381 = vst [vmem:[%s793_s25 + $0x1a0] sm:$0xff] %v283_v42  ;;  %382 = vst [vmem:[%s793_s25 + $0x1a8] sm:$0xff] %v284_v43  ;;  %v289_v54 = vmax.f32 %v191_v51, 0.0  ;;  %v290_v55 = vmax.f32 %v192_v52, 0.0  ;;  %v193_v56 = vld [vmem:[%s783_s23 + $0x1e0] sm:$0xff]  ;;  %v194_v57 = vld [vmem:[%s783_s23 + $0x1e8] sm:$0xff] }
  0x55   : > { %v195_v58 = vld [vmem:[%s783_s23 + $0x1f0] sm:$0xff]  ;;  %383 = vst [vmem:[%s793_s25 + $0x1b0] sm:$0xff] %v285_v47  ;;  %384 = vst [vmem:[%s793_s25 + $0x1b8] sm:$0xff] %v286_v48  ;;  %v291_v59 = vmax.f32 %v193_v56, 0.0  ;;  %v292_v60 = vmax.f32 %v194_v57, 0.0  ;;  %v196_v62 = vld [vmem:[%s783_s23 + $0x1f8] sm:$0xff] }
  0x56   : > { %385 = vst [vmem:[%s793_s25 + $0x1c0] sm:$0xff] %v287_v49  ;;  %v293_v61 = vmax.f32 %v195_v58, 0.0  ;;  %v197_v63 = vld [vmem:[%s783_s23 + $0x200] sm:$0xff]  ;;  %v198_v0 = vld [vmem:[%s783_s23 + $0x208] sm:$0xff]  ;;  %386 = vst [vmem:[%s793_s25 + $0x1c8] sm:$0xff] %v288_v53  ;;  %v294_v1 = vmax.f32 %v196_v62, 0.0 }
  0x57   : > { %387 = vst [vmem:[%s793_s25 + $0x1d0] sm:$0xff] %v289_v54  ;;  %388 = vst [vmem:[%s793_s25 + $0x1d8] sm:$0xff] %v290_v55  ;;  %v295_v2 = vmax.f32 %v197_v63, 0.0  ;;  %v296_v3 = vmax.f32 %v198_v0, 0.0  ;;  %v199_v4 = vld [vmem:[%s783_s23 + $0x210] sm:$0xff]  ;;  %v200_v5 = vld [vmem:[%s783_s23 + $0x218] sm:$0xff] }
  0x58   : > { %v201_v6 = vld [vmem:[%s783_s23 + $0x220] sm:$0xff]  ;;  %389 = vst [vmem:[%s793_s25 + $0x1e0] sm:$0xff] %v291_v59  ;;  %390 = vst [vmem:[%s793_s25 + $0x1e8] sm:$0xff] %v292_v60  ;;  %v297_v7 = vmax.f32 %v199_v4, 0.0  ;;  %v298_v8 = vmax.f32 %v200_v5, 0.0  ;;  %v202_v10 = vld [vmem:[%s783_s23 + $0x228] sm:$0xff] }
  0x59   : > { %391 = vst [vmem:[%s793_s25 + $0x1f0] sm:$0xff] %v293_v61  ;;  %v299_v9 = vmax.f32 %v201_v6, 0.0  ;;  %v203_v11 = vld [vmem:[%s783_s23 + $0x230] sm:$0xff]  ;;  %v204_v12 = vld [vmem:[%s783_s23 + $0x238] sm:$0xff]  ;;  %392 = vst [vmem:[%s793_s25 + $0x1f8] sm:$0xff] %v294_v1  ;;  %v300_v13 = vmax.f32 %v202_v10, 0.0 }
  0x5a   : > { %393 = vst [vmem:[%s793_s25 + $0x200] sm:$0xff] %v295_v2  ;;  %394 = vst [vmem:[%s793_s25 + $0x208] sm:$0xff] %v296_v3  ;;  %v301_v14 = vmax.f32 %v203_v11, 0.0  ;;  %v302_v15 = vmax.f32 %v204_v12, 0.0  ;;  %v205_v16 = vld [vmem:[%s783_s23 + $0x240] sm:$0xff]  ;;  %v206_v17 = vld [vmem:[%s783_s23 + $0x248] sm:$0xff] }
  0x5b   : > { %v207_v18 = vld [vmem:[%s783_s23 + $0x250] sm:$0xff]  ;;  %395 = vst [vmem:[%s793_s25 + $0x210] sm:$0xff] %v297_v7  ;;  %396 = vst [vmem:[%s793_s25 + $0x218] sm:$0xff] %v298_v8  ;;  %v303_v19 = vmax.f32 %v205_v16, 0.0  ;;  %v304_v20 = vmax.f32 %v206_v17, 0.0  ;;  %v208_v22 = vld [vmem:[%s783_s23 + $0x258] sm:$0xff] }
  0x5c   : > { %397 = vst [vmem:[%s793_s25 + $0x220] sm:$0xff] %v299_v9  ;;  %v305_v21 = vmax.f32 %v207_v18, 0.0  ;;  %v209_v23 = vld [vmem:[%s783_s23 + $0x260] sm:$0xff]  ;;  %v210_v24 = vld [vmem:[%s783_s23 + $0x268] sm:$0xff]  ;;  %398 = vst [vmem:[%s793_s25 + $0x228] sm:$0xff] %v300_v13  ;;  %v306_v25 = vmax.f32 %v208_v22, 0.0 }
  0x5d   : > { %399 = vst [vmem:[%s793_s25 + $0x230] sm:$0xff] %v301_v14  ;;  %400 = vst [vmem:[%s793_s25 + $0x238] sm:$0xff] %v302_v15  ;;  %v307_v26 = vmax.f32 %v209_v23, 0.0  ;;  %v308_v27 = vmax.f32 %v210_v24, 0.0  ;;  %v211_v28 = vld [vmem:[%s783_s23 + $0x270] sm:$0xff]  ;;  %v212_v29 = vld [vmem:[%s783_s23 + $0x278] sm:$0xff] }
  0x5e   : > { %v213_v30 = vld [vmem:[%s783_s23 + $0x280] sm:$0xff]  ;;  %401 = vst [vmem:[%s793_s25 + $0x240] sm:$0xff] %v303_v19  ;;  %402 = vst [vmem:[%s793_s25 + $0x248] sm:$0xff] %v304_v20  ;;  %v309_v31 = vmax.f32 %v211_v28, 0.0  ;;  %v310_v32 = vmax.f32 %v212_v29, 0.0  ;;  %v214_v34 = vld [vmem:[%s783_s23 + $0x288] sm:$0xff] }
  0x5f   : > { %403 = vst [vmem:[%s793_s25 + $0x250] sm:$0xff] %v305_v21  ;;  %v311_v33 = vmax.f32 %v213_v30, 0.0  ;;  %v215_v35 = vld [vmem:[%s783_s23 + $0x290] sm:$0xff]  ;;  %v216_v36 = vld [vmem:[%s783_s23 + $0x298] sm:$0xff]  ;;  %404 = vst [vmem:[%s793_s25 + $0x258] sm:$0xff] %v306_v25  ;;  %v312_v37 = vmax.f32 %v214_v34, 0.0 }
  0x60   : > { %405 = vst [vmem:[%s793_s25 + $0x260] sm:$0xff] %v307_v26  ;;  %406 = vst [vmem:[%s793_s25 + $0x268] sm:$0xff] %v308_v27  ;;  %v313_v38 = vmax.f32 %v215_v35, 0.0  ;;  %v314_v39 = vmax.f32 %v216_v36, 0.0  ;;  %v217_v40 = vld [vmem:[%s783_s23 + $0x2a0] sm:$0xff]  ;;  %v218_v41 = vld [vmem:[%s783_s23 + $0x2a8] sm:$0xff] }
  0x61   : > { %v219_v42 = vld [vmem:[%s783_s23 + $0x2b0] sm:$0xff]  ;;  %407 = vst [vmem:[%s793_s25 + $0x270] sm:$0xff] %v309_v31  ;;  %408 = vst [vmem:[%s793_s25 + $0x278] sm:$0xff] %v310_v32  ;;  %v315_v43 = vmax.f32 %v217_v40, 0.0  ;;  %v316_v44 = vmax.f32 %v218_v41, 0.0  ;;  %v220_v46 = vld [vmem:[%s783_s23 + $0x2b8] sm:$0xff] }
  0x62   : > { %409 = vst [vmem:[%s793_s25 + $0x280] sm:$0xff] %v311_v33  ;;  %v317_v45 = vmax.f32 %v219_v42, 0.0  ;;  %v221_v47 = vld [vmem:[%s783_s23 + $0x2c0] sm:$0xff]  ;;  %v222_v48 = vld [vmem:[%s783_s23 + $0x2c8] sm:$0xff]  ;;  %410 = vst [vmem:[%s793_s25 + $0x288] sm:$0xff] %v312_v37  ;;  %v318_v49 = vmax.f32 %v220_v46, 0.0 }
  0x63   : > { %411 = vst [vmem:[%s793_s25 + $0x290] sm:$0xff] %v313_v38  ;;  %412 = vst [vmem:[%s793_s25 + $0x298] sm:$0xff] %v314_v39  ;;  %v319_v50 = vmax.f32 %v221_v47, 0.0  ;;  %v320_v51 = vmax.f32 %v222_v48, 0.0  ;;  %v223_v52 = vld [vmem:[%s783_s23 + $0x2d0] sm:$0xff]  ;;  %v224_v53 = vld [vmem:[%s783_s23 + $0x2d8] sm:$0xff] }
  0x64   : > { %v225_v54 = vld [vmem:[%s783_s23 + $0x2e0] sm:$0xff]  ;;  %413 = vst [vmem:[%s793_s25 + $0x2a0] sm:$0xff] %v315_v43  ;;  %414 = vst [vmem:[%s793_s25 + $0x2a8] sm:$0xff] %v316_v44  ;;  %v321_v55 = vmax.f32 %v223_v52, 0.0  ;;  %v322_v56 = vmax.f32 %v224_v53, 0.0  ;;  %v226_v58 = vld [vmem:[%s783_s23 + $0x2e8] sm:$0xff] }
  0x65   : > { %415 = vst [vmem:[%s793_s25 + $0x2b0] sm:$0xff] %v317_v45  ;;  %v323_v57 = vmax.f32 %v225_v54, 0.0  ;;  %v227_v59 = vld [vmem:[%s783_s23 + $0x2f0] sm:$0xff]  ;;  %v228_v60 = vld [vmem:[%s783_s23 + $0x2f8] sm:$0xff]  ;;  %416 = vst [vmem:[%s793_s25 + $0x2b8] sm:$0xff] %v318_v49  ;;  %v324_v61 = vmax.f32 %v226_v58, 0.0 }
  0x66   : > { %417 = vst [vmem:[%s793_s25 + $0x2c0] sm:$0xff] %v319_v50  ;;  %418 = vst [vmem:[%s793_s25 + $0x2c8] sm:$0xff] %v320_v51  ;;  %v325_v62 = vmax.f32 %v227_v59, 0.0  ;;  %v326_v63 = vmax.f32 %v228_v60, 0.0  ;;  %v229_v0 = vld [vmem:[%s783_s23 + $0x300] sm:$0xff]  ;;  %v230_v1 = vld [vmem:[%s783_s23 + $0x308] sm:$0xff] }
  0x67   : > { %419 = vst [vmem:[%s793_s25 + $0x2d0] sm:$0xff] %v321_v55  ;;  %420 = vst [vmem:[%s793_s25 + $0x2d8] sm:$0xff] %v322_v56  ;;  %v327_v2 = vmax.f32 %v229_v0, 0.0  ;;  %v328_v3 = vmax.f32 %v230_v1, 0.0  ;;  %s428_s29 = scalar_lea.sflag [#allocation4], %s779_s20  ;;  %s600_s30 = scalar_lea.vmem %s993_s16, 12544 }
  0x68   : > { %421 = vst [vmem:[%s793_s25 + $0x2e0] sm:$0xff] %v323_v57  ;;  %422 = vst [vmem:[%s793_s25 + $0x2e8] sm:$0xff] %v324_v61  ;;  %p601_p6 = scmp.ne.s32.totalorder %s993_s16, %s600_s30  ;;  %p1049_p11 = scmp.ne.s32.totalorder %s1044_s17, 0 }
  0x69   : > { %423 = vst [vmem:[%s793_s25 + $0x2f0] sm:$0xff] %v325_v62  ;;  %424 = vst [vmem:[%s793_s25 + $0x2f8] sm:$0xff] %v326_v63  ;;  %s669_s10 = smov [#allocation5]  }
  0x6a   : > { %425 = vst [vmem:[%s793_s25 + $0x300] sm:$0xff] %v327_v2  ;;  %426 = vst [vmem:[%s793_s25 + $0x308] sm:$0xff] %v328_v3  ;;  %p602_p12 = pnand %p601_p6, %p1049_p11  ;;  %s604_s2 = sshll.u32 %s669_s10, 4  ;;  %s605_s2 = int_to_ptr.vmem [resolvable:$false] %s604_s2 }
  0x6b   : > { %s606_s3 = scalar_lea.vmem %s605_s2, 25088  ;;  %p607_p5 = scmp.lt.s32.totalorder %s993_s16, %s605_s2 }
  0x6c   : > { %p603_p13 = pneg %p602_p12  ;;  %p608_p10 = scmp.lt.s32.totalorder %s606_s3, %s600_s30 }
  0x6e   : > { %p609_p2 = por %p608_p10, %p607_p5 }
  0x70   : > { %p610_p4 = pnand %p609_p2, %p603_p13 }
  0x72   : > { %613 = shalt.err (!%p610_p4)
}
  0x73   : > { %s614_s4 = scalar_lea.hbm %s989_s28, 12544  ;;  %s618_s13 = scalar_lea.hbm %s1041_s1, 25088 }
  0x74   : > { %p615_p7 = scmp.ne.s32.totalorder %s989_s28, %s614_s4  ;;  %p619_p0 = scmp.lt.u32.totalorder %s989_s28, %s1041_s1 }
  0x75   : > { %p620_p1 = scmp.lt.u32.totalorder %s618_s13, %s614_s4  ;;  %p622_p6 = scmp.lt.u32.totalorder %s614_s4, %s989_s28 }
  0x76   : > { %p616_p8 = pnand %p615_p7, %p1049_p11 }
  0x77   : > { %p621_p3 = por %p620_p1, %p619_p0 }
  0x78   : > { %p617_p9 = pneg %p616_p8 }
  0x79   : > { %p623_p12 = por %p622_p6, %p621_p3 }
  0x7b   : > { %p624_p13 = pnand %p623_p12, %p617_p9 }
  0x7d   : > { %627 = shalt.err (!%p624_p13)
}
  0x7e   : > { %526 = dma.vmem_to_hbm [thread:$0]  (%p1049_p11), %s993_s16, 12544, %s989_s28, %s428_s29  }
  0x7f PF: > { %s454_s20 = sand.u32 1, %s654_s6   ;;  %p1050_p5 = scmp.ne.s32.totalorder %s1045_s18, 0 }
  0x80   : > { %p1051_p10 = scmp.ge.s32.totalorder %s666_s9, 2  ;;  %s455_s21 = scalar_lea.sflag [#allocation4], %s454_s20 }
  0x82   : > { %p533_p2 = pnand %p1051_p10, %p1050_p5 }
  0x84   : > { %649 = dma.done.wait (!%p533_p2), %s455_s21, 12544  }
  0x85   : > { %651 = vsyncadd (!%p533_p2), %s455_s21, 4294954752  ;;  %p14_p4 = scmp.ge.s32.totalorder %s705_s12, 4   ;;  %s1052_s6 = smov %s658_s7 }
  0x86   : > { %s1053_s7 = smov %s662_s8  ;;  %s1054_s8 = smov %s717_s15 }
  0x87   : > { %s1055_s9 = smov %s705_s12  ;;  %16 = sbr.rel (!%p14_p4) target bundleno = 5 (0x5), region = 69 }
  0x8e   :  { %460 = vsyncpa [#allocation3], 1 }
  0x8f   :  { %462 = vsyncpa [#allocation3 + $0x1], 1 }
  0x90   :  { %463 = vsyncpa [#allocation4], 1 }
  0x91   :  { %465 = vsyncpa [#allocation4 + $0x1], 1 }

</bundles_post_ra>
